<compile_context>
chip_gen: v6e
topology: v6e:2x2x1
jax: 0.10.0
libtpu: 0.0.40
codegen_flags: <defaults>
</compile_context>

<pallas_src>
import math

import jax
import jax.numpy as jnp
from jax import lax
from jax.experimental import pallas as pl
from jax.experimental.pallas import tpu as pltpu

BN_EPS = 1e-5
KH = KW = 3


def conv_bn_relu_kernel(x_ref, t_ref, fold_ref, bcast_ref, gamma_ref, beta_ref,
                        z_ref, y_scr, s1_scr, scale_scr, shift_scr):
    """Fused Conv3x3(pad=1) + training-mode BatchNorm + ReLU.

    Layouts (lane dim last):
      x_ref   (1, H, W*Cin)       one image, lanes = (w, cin)
      t_ref   (3, W*Cin, W*Cout)  banded weight matrix per dy (W-pad folded in)
      fold    (W*Cout, Cout)      lane -> channel summation matrix (0/1)
      bcast   (Cout, W*Cout)      channel -> lane broadcast matrix (0/1)
      gamma/beta (1, Cout)
      z_ref   (1, H, W*Cout)      lanes = (w, cout): lane-dense, unpadded
      y_scr   (N, H, W*Cout)      conv output for the whole batch (VMEM resident)
      s1_scr  (1, W*Cout)         per-(w, cout) running sum
      scale_scr / shift_scr (1, W*Cout)
    """
    p = pl.program_id(0)            # 0: conv + sums   1: BN finalize + apply
    n = pl.program_id(1)            # image index

    _, h, _ = x_ref.shape
    wcout = z_ref.shape[2]
    cout = fold_ref.shape[1]
    wdim = wcout // cout

    @pl.when(p == 0)
    def _conv_and_sum():
        @pl.when(n == 0)
        def _():
            s1_scr[...] = jnp.zeros_like(s1_scr)

        x0 = x_ref[0]                                               # (H, W*Cin)
        row = lax.broadcasted_iota(jnp.int32, x0.shape, 0)
        # In-kernel H zero-padding: rows h-1 / h+1 with zeroed edge rows.
        x_m1 = jnp.where(row == 0, 0.0, pltpu.roll(x0, shift=1, axis=0))
        x_p1 = jnp.where(row == h - 1, 0.0, pltpu.roll(x0, shift=h - 1, axis=0))

        # Three MXU matmuls (one per dy); dx/cin accumulate along K in the MXU.
        y = jnp.dot(x_m1, t_ref[0], preferred_element_type=jnp.float32)
        y += jnp.dot(x0, t_ref[1], preferred_element_type=jnp.float32)
        y += jnp.dot(x_p1, t_ref[2], preferred_element_type=jnp.float32)

        y_scr[n] = y                                  # stays resident in VMEM
        s1_scr[...] += jnp.sum(y, axis=0, keepdims=True)

    @pl.when(p == 1)
    def _bn_relu():
        @pl.when(n == 0)
        def _finalize_stats():
            n_imgs = y_scr.shape[0]
            count = n_imgs * h * wdim                               # N*H*W
            s1_c = jnp.dot(s1_scr[...], fold_ref[...],
                           preferred_element_type=jnp.float32)       # (1, Cout)
            mean_c = s1_c / count
            mean_lane = jnp.dot(mean_c, bcast_ref[...],
                                preferred_element_type=jnp.float32)  # (1, W*Cout)
            # Centered (two-pass) variance over the VMEM-resident conv output.
            ss_lane = jnp.zeros_like(s1_scr[...])
            for i in range(n_imgs):                   # static unroll; N small
                d = y_scr[i] - mean_lane
                ss_lane = ss_lane + jnp.sum(d * d, axis=0, keepdims=True)
            var_c = jnp.dot(ss_lane, fold_ref[...],
                            preferred_element_type=jnp.float32) / count
            scale_c = gamma_ref[...] * lax.rsqrt(var_c + BN_EPS)     # (1, Cout)
            shift_c = beta_ref[...] - mean_c * scale_c
            scale_scr[...] = jnp.dot(scale_c, bcast_ref[...],
                                     preferred_element_type=jnp.float32)
            shift_scr[...] = jnp.dot(shift_c, bcast_ref[...],
                                     preferred_element_type=jnp.float32)

        z_ref[0] = jnp.maximum(
            y_scr[n] * scale_scr[...] + shift_scr[...], 0.0
        ).astype(z_ref.dtype)


def conv_block(x_nchw, w_oihw, conv_bias, bn_gamma, bn_beta):
    """Forward pass of ConvBlock.  x_nchw: (N, Cin, H, W) -> (N, Cout, H, W)."""
    del conv_bias  # cancels exactly under training-mode BatchNorm (see header)

    N, Cin, H, W = x_nchw.shape
    Cout = w_oihw.shape[0]
    WCin, WCout = W * Cin, W * Cout

    # ---- layout glue on x: one small transpose; the reshape is free --------
    # TODO(synk): fold this transpose into the kernel (read NCHW directly) if
    # the extra x-sized HBM pass ever matters; at Cin=4 / 8 KiB it does not.
    x2 = jnp.transpose(x_nchw, (0, 2, 3, 1)).reshape(N, H, WCin).astype(jnp.float32)

    # ---- banded weight matrices: conv W-padding folded into the band -------
    # T[dy, w_in*Cin+cin, w_out*Cout+cout] = w[cout, cin, dy, w_in-w_out+1]
    # (zero outside the 3-wide band, i.e. outside the image in W).
    wt = jnp.transpose(w_oihw, (2, 3, 1, 0)).astype(jnp.float32)   # (3,3,Cin,Cout)
    rr = jnp.arange(WCin)
    cc = jnp.arange(WCout)
    w_in, cin_i = rr // Cin, rr % Cin
    w_out, cout_i = cc // Cout, cc % Cout
    dx = w_in[:, None] - w_out[None, :] + 1
    valid = ((dx >= 0) & (dx < KW)).astype(jnp.float32)
    t_banded = (wt[:, jnp.clip(dx, 0, KW - 1), cin_i[:, None], cout_i[None, :]]
                * valid[None])                                     # (3, WCin, WCout)

    # lane <-> channel helper matrices (constant 0/1)
    fold = (cc[:, None] % Cout == jnp.arange(Cout)[None, :]).astype(jnp.float32)
    bcast = jnp.transpose(fold)                                    # (Cout, WCout)

    gamma2 = bn_gamma.reshape(1, Cout).astype(jnp.float32)
    beta2 = bn_beta.reshape(1, Cout).astype(jnp.float32)

    cost = pl.CostEstimate(
        flops=2 * N * H * KH * WCin * WCout + 4 * N * H * WCout,
        transcendentals=Cout,
        bytes_accessed=4 * (x2.size + t_banded.size + fold.size + bcast.size
                            + gamma2.size + beta2.size + N * H * WCout),
    )

    z = pl.pallas_call(
        conv_bn_relu_kernel,
        out_shape=jax.ShapeDtypeStruct((N, H, WCout), jnp.float32),
        grid=(2, N),                                  # (phase, image)
        in_specs=[
            pl.BlockSpec((1, H, WCin), lambda p, n: ((1 - p) * n, 0, 0)),
            pl.BlockSpec((KH, WCin, WCout), lambda p, n: (0, 0, 0)),
            pl.BlockSpec((WCout, Cout), lambda p, n: (0, 0)),
            pl.BlockSpec((Cout, WCout), lambda p, n: (0, 0)),
            pl.BlockSpec((1, Cout), lambda p, n: (0, 0)),
            pl.BlockSpec((1, Cout), lambda p, n: (0, 0)),
        ],
        # Phase 0 keeps mapping to block 0 (never copied out before phase 1
        # fully rewrites it), phase 1 writes block n -> exactly N writebacks.
        out_specs=pl.BlockSpec((1, H, WCout), lambda p, n: (p * n, 0, 0)),
        scratch_shapes=[
            pltpu.VMEM((N, H, WCout), jnp.float32),   # y (whole batch, resident)
            pltpu.VMEM((1, WCout), jnp.float32),      # per-(w, cout) sums
            pltpu.VMEM((1, WCout), jnp.float32),      # scale (per lane)
            pltpu.VMEM((1, WCout), jnp.float32),      # shift (per lane)
        ],
        compiler_params=pltpu.CompilerParams(
            dimension_semantics=("arbitrary", "arbitrary"),
            vmem_limit_bytes=32 * 1024 * 1024,
        ),
        cost_estimate=cost,
    )(x2, t_banded, fold, bcast, gamma2, beta2)

    # (N, H, W*Cout) -> (N, H, W, Cout) is a free bitcast; one tiny transpose.
    return jnp.transpose(z.reshape(N, H, W, Cout), (0, 3, 1, 2))


def reference_conv_block(x_nchw, w_oihw, conv_bias, bn_gamma, bn_beta):
    """Pure-JAX reference (NCHW conv + training-mode BN + ReLU)."""
    y = lax.conv_general_dilated(
        x_nchw, w_oihw, window_strides=(1, 1), padding=((1, 1), (1, 1)),
        dimension_numbers=("NCHW", "OIHW", "NCHW"),
    ) + conv_bias[None, :, None, None]
    mean = jnp.mean(y, axis=(0, 2, 3), keepdims=True)
    var = jnp.mean((y - mean) ** 2, axis=(0, 2, 3), keepdims=True)
    y_hat = (y - mean) * lax.rsqrt(var + BN_EPS)
    z = bn_gamma[None, :, None, None] * y_hat + bn_beta[None, :, None, None]
    return jnp.maximum(z, 0.0)


if __name__ == "__main__":
    # small shapes consistent with the module
    N, Cin, Cout, H, W = 2, 4, 8, 16, 16

    key = jax.random.PRNGKey(0)
    k_x, k_w, k_b = jax.random.split(key, 3)

    x = jax.random.normal(k_x, (N, Cin, H, W), dtype=jnp.float32)

    # kaiming_normal_(nonlinearity='relu'): std = sqrt(2 / fan_in), fan_in = Cin*3*3
    fan_in = Cin * KH * KW
    w = jax.random.normal(k_w, (Cout, Cin, KH, KW), dtype=jnp.float32) * math.sqrt(
        2.0 / fan_in
    )
    # default Conv2d bias init: U(-1/sqrt(fan_in), 1/sqrt(fan_in))
    bound = 1.0 / math.sqrt(fan_in)
    b = jax.random.uniform(k_b, (Cout,), minval=-bound, maxval=bound,
                           dtype=jnp.float32)
    # bn1.weight = 0.5, bn1.bias = 0
    gamma = jnp.full((Cout,), 0.5, dtype=jnp.float32)
    beta = jnp.zeros((Cout,), dtype=jnp.float32)

    out = jax.jit(conv_block)(x, w, b, gamma, beta)
    out = jax.block_until_ready(out)

    ref = reference_conv_block(x, w, b, gamma, beta)
    assert out.shape == (N, Cout, H, W)
    assert jnp.allclose(out, ref, rtol=1e-3, atol=1e-3), "mismatch vs reference"

    print("KERNEL_OK")
</pallas_src>

<mosaic_0001>
module attributes {stable_mosaic.version = 11 : i64} {
  func.func @conv_bn_relu_kernel(%arg0: i32, %arg1: i32, %arg2: memref<1x16x64xf32, #tpu.memory_space<vmem>>, %arg3: memref<3x64x128xf32, #tpu.memory_space<vmem>>, %arg4: memref<128x8xf32, #tpu.memory_space<vmem>>, %arg5: memref<8x128xf32, #tpu.memory_space<vmem>>, %arg6: memref<1x8xf32, #tpu.memory_space<vmem>>, %arg7: memref<1x8xf32, #tpu.memory_space<vmem>>, %arg8: memref<1x16x128xf32, #tpu.memory_space<vmem>>, %arg9: memref<2x16x128xf32, #tpu.memory_space<vmem>>, %arg10: memref<1x128xf32, #tpu.memory_space<vmem>>, %arg11: memref<1x128xf32, #tpu.memory_space<vmem>>, %arg12: memref<1x128xf32, #tpu.memory_space<vmem>>) attributes {dimension_semantics = [#tpu.dimension_semantics<arbitrary>, #tpu.dimension_semantics<arbitrary>], iteration_bounds = array<i64: 2, 2>, scalar_prefetch = 0 : i64, scratch_operands = 4 : i64, tpu.core_type = #tpu.core_type<tc>, window_params = [{transform_indices = @transform_0, window_bounds = array<i64: 1, 16, 64>}, {pipeline_mode = #tpu.pipeline_mode<synchronous>, transform_indices = @transform_1, window_bounds = array<i64: 3, 64, 128>}, {pipeline_mode = #tpu.pipeline_mode<synchronous>, transform_indices = @transform_2, window_bounds = array<i64: 128, 8>}, {pipeline_mode = #tpu.pipeline_mode<synchronous>, transform_indices = @transform_3, window_bounds = array<i64: 8, 128>}, {pipeline_mode = #tpu.pipeline_mode<synchronous>, transform_indices = @transform_4, window_bounds = array<i64: 1, 8>}, {pipeline_mode = #tpu.pipeline_mode<synchronous>, transform_indices = @transform_5, window_bounds = array<i64: 1, 8>}, {transform_indices = @transform_6, window_bounds = array<i64: 1, 16, 128>}]} {
    %c0_i32 = arith.constant 0 : i32
    %0 = arith.cmpi eq, %arg0, %c0_i32 : i32
    %1 = arith.extui %0 : i1 to i32
    %c0_i32_0 = arith.constant 0 : i32
    %2 = arith.cmpi ne, %1, %c0_i32_0 : i32
    scf.if %2 {
      %c0_i32_2 = arith.constant 0 : i32
      %6 = arith.cmpi eq, %arg1, %c0_i32_2 : i32
      %7 = arith.extui %6 : i1 to i32
      %c0_i32_3 = arith.constant 0 : i32
      %8 = arith.cmpi ne, %7, %c0_i32_3 : i32
      scf.if %8 {
        %cst_27 = arith.constant 0.000000e+00 : f32
        %42 = vector.broadcast %cst_27 : f32 to vector<1x128xf32>
        %c0_28 = arith.constant 0 : index
        %c0_29 = arith.constant 0 : index
        %43 = vector.load %arg10[%c0_28, %c0_29] : memref<1x128xf32, #tpu.memory_space<vmem>>, vector<1x128xf32>
        tpu.vector_store %arg10[%c0_28, %c0_29], %42 {strides = array<i32>} : memref<1x128xf32, #tpu.memory_space<vmem>>, vector<1x128xf32>,
      } else {
      }
      %c0 = arith.constant 0 : index
      %c0_4 = arith.constant 0 : index
      %c0_5 = arith.constant 0 : index
      %9 = vector.load %arg2[%c0, %c0_4, %c0_5] : memref<1x16x64xf32, #tpu.memory_space<vmem>>, vector<1x16x64xf32>
      %10 = vector.shape_cast %9 : vector<1x16x64xf32> to vector<16x64xf32>
      %11 = tpu.iota {dimensions = array<i32: 0>} : vector<16x64xi32>
      %c0_i32_6 = arith.constant 0 : i32
      %12 = vector.broadcast %c0_i32_6 : i32 to vector<16x64xi32>
      %13 = arith.cmpi eq, %11, %12 : vector<16x64xi32>
      %c1_i32_7 = arith.constant 1 : i32
      %14 = tpu.dynamic_rotate %10 by %c1_i32_7 dim 0 : vector<16x64xf32>, i32 -> vector<16x64xf32>
      %cst = arith.constant 0.000000e+00 : f32
      %15 = vector.broadcast %cst : f32 to vector<16x64xf32>
      %16 = arith.select %13, %15, %14 : vector<16x64xi1>, vector<16x64xf32>
      %c15_i32 = arith.constant 15 : i32
      %17 = vector.broadcast %c15_i32 : i32 to vector<16x64xi32>
      %18 = arith.cmpi eq, %11, %17 : vector<16x64xi32>
      %c15_i32_8 = arith.constant 15 : i32
      %19 = tpu.dynamic_rotate %10 by %c15_i32_8 dim 0 : vector<16x64xf32>, i32 -> vector<16x64xf32>
      %cst_9 = arith.constant 0.000000e+00 : f32
      %20 = vector.broadcast %cst_9 : f32 to vector<16x64xf32>
      %21 = arith.select %18, %20, %19 : vector<16x64xi1>, vector<16x64xf32>
      %c0_10 = arith.constant 0 : index
      %c0_11 = arith.constant 0 : index
      %c0_12 = arith.constant 0 : index
      %22 = vector.load %arg3[%c0_10, %c0_11, %c0_12] : memref<3x64x128xf32, #tpu.memory_space<vmem>>, vector<1x64x128xf32>
      %23 = vector.shape_cast %22 : vector<1x64x128xf32> to vector<64x128xf32>
      %cst_13 = arith.constant dense<0.000000e+00> : vector<16x128xf32>
      %24 = tpu.matmul %16, %23, %cst_13 {dimension_numbers = #tpu.dot_dimension_numbers<[1], [0], [0], [1], [0, 0, 1, 1], [], []>} : vector<16x64xf32>, vector<64x128xf32>, vector<16x128xf32> -> vector<16x128xf32>
      %c1 = arith.constant 1 : index
      %c0_14 = arith.constant 0 : index
      %c0_15 = arith.constant 0 : index
      %25 = vector.load %arg3[%c1, %c0_14, %c0_15] : memref<3x64x128xf32, #tpu.memory_space<vmem>>, vector<1x64x128xf32>
      %26 = vector.shape_cast %25 : vector<1x64x128xf32> to vector<64x128xf32>
      %cst_16 = arith.constant dense<0.000000e+00> : vector<16x128xf32>
      %27 = tpu.matmul %10, %26, %cst_16 {dimension_numbers = #tpu.dot_dimension_numbers<[1], [0], [0], [1], [0, 0, 1, 1], [], []>} : vector<16x64xf32>, vector<64x128xf32>, vector<16x128xf32> -> vector<16x128xf32>
      %28 = arith.addf %24, %27 : vector<16x128xf32>
      %c2 = arith.constant 2 : index
      %c0_17 = arith.constant 0 : index
      %c0_18 = arith.constant 0 : index
      %29 = vector.load %arg3[%c2, %c0_17, %c0_18] : memref<3x64x128xf32, #tpu.memory_space<vmem>>, vector<1x64x128xf32>
      %30 = vector.shape_cast %29 : vector<1x64x128xf32> to vector<64x128xf32>
      %cst_19 = arith.constant dense<0.000000e+00> : vector<16x128xf32>
      %31 = tpu.matmul %21, %30, %cst_19 {dimension_numbers = #tpu.dot_dimension_numbers<[1], [0], [0], [1], [0, 0, 1, 1], [], []>} : vector<16x64xf32>, vector<64x128xf32>, vector<16x128xf32> -> vector<16x128xf32>
      %32 = arith.addf %28, %31 : vector<16x128xf32>
      %33 = arith.index_cast %arg1 : i32 to index
      %c0_20 = arith.constant 0 : index
      %c0_21 = arith.constant 0 : index
      %34 = vector.load %arg9[%33, %c0_20, %c0_21] : memref<2x16x128xf32, #tpu.memory_space<vmem>>, vector<1x16x128xf32>
      %35 = vector.shape_cast %34 : vector<1x16x128xf32> to vector<16x128xf32>
      %36 = vector.shape_cast %32 : vector<16x128xf32> to vector<1x16x128xf32>
      tpu.vector_store %arg9[%33, %c0_20, %c0_21], %36 {strides = array<i32>} : memref<2x16x128xf32, #tpu.memory_space<vmem>>, vector<1x16x128xf32>,
      %c0_22 = arith.constant 0 : index
      %c0_23 = arith.constant 0 : index
      %37 = vector.load %arg10[%c0_22, %c0_23] : memref<1x128xf32, #tpu.memory_space<vmem>>, vector<1x128xf32>
      %cst_24 = arith.constant dense<0.000000e+00> : vector<128xf32>
      %38 = vector.multi_reduction <add>, %32, %cst_24 [0] : vector<16x128xf32> to vector<128xf32>
      %39 = vector.shape_cast %38 : vector<128xf32> to vector<1x128xf32>
      %40 = arith.addf %37, %39 : vector<1x128xf32>
      %c0_25 = arith.constant 0 : index
      %c0_26 = arith.constant 0 : index
      %41 = vector.load %arg10[%c0_25, %c0_26] : memref<1x128xf32, #tpu.memory_space<vmem>>, vector<1x128xf32>
      tpu.vector_store %arg10[%c0_25, %c0_26], %40 {strides = array<i32>} : memref<1x128xf32, #tpu.memory_space<vmem>>, vector<1x128xf32>,
    } else {
    }
    %c1_i32 = arith.constant 1 : i32
    %3 = arith.cmpi eq, %arg0, %c1_i32 : i32
    %4 = arith.extui %3 : i1 to i32
    %c0_i32_1 = arith.constant 0 : i32
    %5 = arith.cmpi ne, %4, %c0_i32_1 : i32
    scf.if %5 {
      %c0_i32_2 = arith.constant 0 : i32
      %6 = arith.cmpi eq, %arg1, %c0_i32_2 : i32
      %7 = arith.extui %6 : i1 to i32
      %c0_i32_3 = arith.constant 0 : i32
      %8 = arith.cmpi ne, %7, %c0_i32_3 : i32
      scf.if %8 {
        %c0_12 = arith.constant 0 : index
        %c0_13 = arith.constant 0 : index
        %23 = vector.load %arg10[%c0_12, %c0_13] : memref<1x128xf32, #tpu.memory_space<vmem>>, vector<1x128xf32>
        %c0_14 = arith.constant 0 : index
        %c0_15 = arith.constant 0 : index
        %24 = vector.load %arg4[%c0_14, %c0_15] : memref<128x8xf32, #tpu.memory_space<vmem>>, vector<128x8xf32>
        %cst_16 = arith.constant dense<0.000000e+00> : vector<1x8xf32>
        %25 = tpu.matmul %23, %24, %cst_16 {dimension_numbers = #tpu.dot_dimension_numbers<[1], [0], [0], [1], [0, 0, 1, 1], [], []>} : vector<1x128xf32>, vector<128x8xf32>, vector<1x8xf32> -> vector<1x8xf32>
        %cst_17 = arith.constant 5.120000e+02 : f32
        %26 = vector.broadcast %cst_17 : f32 to vector<1x8xf32>
        %27 = arith.divf %25, %26 : vector<1x8xf32>
        %c0_18 = arith.constant 0 : index
        %c0_19 = arith.constant 0 : index
        %28 = vector.load %arg5[%c0_18, %c0_19] : memref<8x128xf32, #tpu.memory_space<vmem>>, vector<8x128xf32>
        %cst_20 = arith.constant dense<0.000000e+00> : vector<1x128xf32>
        %29 = tpu.matmul %27, %28, %cst_20 {dimension_numbers = #tpu.dot_dimension_numbers<[1], [0], [0], [1], [0, 0, 1, 1], [], []>} : vector<1x8xf32>, vector<8x128xf32>, vector<1x128xf32> -> vector<1x128xf32>
        %cst_21 = arith.constant 0.000000e+00 : f32
        %30 = vector.broadcast %cst_21 : f32 to vector<1x128xf32>
        %c0_22 = arith.constant 0 : index
        %c0_23 = arith.constant 0 : index
        %c0_24 = arith.constant 0 : index
        %31 = vector.load %arg9[%c0_22, %c0_23, %c0_24] : memref<2x16x128xf32, #tpu.memory_space<vmem>>, vector<1x16x128xf32>
        %32 = vector.shape_cast %31 : vector<1x16x128xf32> to vector<16x128xf32>
        %33 = vector.broadcast %29 : vector<1x128xf32> to vector<16x128xf32>
        %34 = arith.subf %32, %33 : vector<16x128xf32>
        %35 = arith.mulf %34, %34 : vector<16x128xf32>
        %cst_25 = arith.constant dense<0.000000e+00> : vector<128xf32>
        %36 = vector.multi_reduction <add>, %35, %cst_25 [0] : vector<16x128xf32> to vector<128xf32>
        %37 = vector.shape_cast %36 : vector<128xf32> to vector<1x128xf32>
        %38 = arith.addf %30, %37 : vector<1x128xf32>
        %c1 = arith.constant 1 : index
        %c0_26 = arith.constant 0 : index
        %c0_27 = arith.constant 0 : index
        %39 = vector.load %arg9[%c1, %c0_26, %c0_27] : memref<2x16x128xf32, #tpu.memory_space<vmem>>, vector<1x16x128xf32>
        %40 = vector.shape_cast %39 : vector<1x16x128xf32> to vector<16x128xf32>
        %41 = vector.broadcast %29 : vector<1x128xf32> to vector<16x128xf32>
        %42 = arith.subf %40, %41 : vector<16x128xf32>
        %43 = arith.mulf %42, %42 : vector<16x128xf32>
        %cst_28 = arith.constant dense<0.000000e+00> : vector<128xf32>
        %44 = vector.multi_reduction <add>, %43, %cst_28 [0] : vector<16x128xf32> to vector<128xf32>
        %45 = vector.shape_cast %44 : vector<128xf32> to vector<1x128xf32>
        %46 = arith.addf %38, %45 : vector<1x128xf32>
        %c0_29 = arith.constant 0 : index
        %c0_30 = arith.constant 0 : index
        %47 = vector.load %arg4[%c0_29, %c0_30] : memref<128x8xf32, #tpu.memory_space<vmem>>, vector<128x8xf32>
        %cst_31 = arith.constant dense<0.000000e+00> : vector<1x8xf32>
        %48 = tpu.matmul %46, %47, %cst_31 {dimension_numbers = #tpu.dot_dimension_numbers<[1], [0], [0], [1], [0, 0, 1, 1], [], []>} : vector<1x128xf32>, vector<128x8xf32>, vector<1x8xf32> -> vector<1x8xf32>
        %cst_32 = arith.constant 5.120000e+02 : f32
        %49 = vector.broadcast %cst_32 : f32 to vector<1x8xf32>
        %50 = arith.divf %48, %49 : vector<1x8xf32>
        %c0_33 = arith.constant 0 : index
        %c0_34 = arith.constant 0 : index
        %51 = vector.load %arg6[%c0_33, %c0_34] : memref<1x8xf32, #tpu.memory_space<vmem>>, vector<1x8xf32>
        %cst_35 = arith.constant 9.99999974E-6 : f32
        %52 = vector.broadcast %cst_35 : f32 to vector<1x8xf32>
        %53 = arith.addf %50, %52 : vector<1x8xf32>
        %54 = math.rsqrt %53 : vector<1x8xf32>
        %55 = arith.mulf %51, %54 : vector<1x8xf32>
        %c0_36 = arith.constant 0 : index
        %c0_37 = arith.constant 0 : index
        %56 = vector.load %arg7[%c0_36, %c0_37] : memref<1x8xf32, #tpu.memory_space<vmem>>, vector<1x8xf32>
        %57 = arith.mulf %27, %55 : vector<1x8xf32>
        %58 = arith.subf %56, %57 : vector<1x8xf32>
        %c0_38 = arith.constant 0 : index
        %c0_39 = arith.constant 0 : index
        %59 = vector.load %arg5[%c0_38, %c0_39] : memref<8x128xf32, #tpu.memory_space<vmem>>, vector<8x128xf32>
        %cst_40 = arith.constant dense<0.000000e+00> : vector<1x128xf32>
        %60 = tpu.matmul %55, %59, %cst_40 {dimension_numbers = #tpu.dot_dimension_numbers<[1], [0], [0], [1], [0, 0, 1, 1], [], []>} : vector<1x8xf32>, vector<8x128xf32>, vector<1x128xf32> -> vector<1x128xf32>
        %c0_41 = arith.constant 0 : index
        %c0_42 = arith.constant 0 : index
        %61 = vector.load %arg11[%c0_41, %c0_42] : memref<1x128xf32, #tpu.memory_space<vmem>>, vector<1x128xf32>
        tpu.vector_store %arg11[%c0_41, %c0_42], %60 {strides = array<i32>} : memref<1x128xf32, #tpu.memory_space<vmem>>, vector<1x128xf32>,
        %c0_43 = arith.constant 0 : index
        %c0_44 = arith.constant 0 : index
        %62 = vector.load %arg5[%c0_43, %c0_44] : memref<8x128xf32, #tpu.memory_space<vmem>>, vector<8x128xf32>
        %cst_45 = arith.constant dense<0.000000e+00> : vector<1x128xf32>
        %63 = tpu.matmul %58, %62, %cst_45 {dimension_numbers = #tpu.dot_dimension_numbers<[1], [0], [0], [1], [0, 0, 1, 1], [], []>} : vector<1x8xf32>, vector<8x128xf32>, vector<1x128xf32> -> vector<1x128xf32>
        %c0_46 = arith.constant 0 : index
        %c0_47 = arith.constant 0 : index
        %64 = vector.load %arg12[%c0_46, %c0_47] : memref<1x128xf32, #tpu.memory_space<vmem>>, vector<1x128xf32>
        tpu.vector_store %arg12[%c0_46, %c0_47], %63 {strides = array<i32>} : memref<1x128xf32, #tpu.memory_space<vmem>>, vector<1x128xf32>,
      } else {
      }
      %9 = arith.index_cast %arg1 : i32 to index
      %c0 = arith.constant 0 : index
      %c0_4 = arith.constant 0 : index
      %10 = vector.load %arg9[%9, %c0, %c0_4] : memref<2x16x128xf32, #tpu.memory_space<vmem>>, vector<1x16x128xf32>
      %11 = vector.shape_cast %10 : vector<1x16x128xf32> to vector<16x128xf32>
      %c0_5 = arith.constant 0 : index
      %c0_6 = arith.constant 0 : index
      %12 = vector.load %arg11[%c0_5, %c0_6] : memref<1x128xf32, #tpu.memory_space<vmem>>, vector<1x128xf32>
      %13 = vector.broadcast %12 : vector<1x128xf32> to vector<16x128xf32>
      %14 = arith.mulf %11, %13 : vector<16x128xf32>
      %c0_7 = arith.constant 0 : index
      %c0_8 = arith.constant 0 : index
      %15 = vector.load %arg12[%c0_7, %c0_8] : memref<1x128xf32, #tpu.memory_space<vmem>>, vector<1x128xf32>
      %16 = vector.broadcast %15 : vector<1x128xf32> to vector<16x128xf32>
      %17 = arith.addf %14, %16 : vector<16x128xf32>
      %cst = arith.constant 0.000000e+00 : f32
      %18 = vector.broadcast %cst : f32 to vector<16x128xf32>
      %19 = arith.maximumf %17, %18 : vector<16x128xf32>
      %c0_9 = arith.constant 0 : index
      %c0_10 = arith.constant 0 : index
      %c0_11 = arith.constant 0 : index
      %20 = vector.load %arg8[%c0_9, %c0_10, %c0_11] : memref<1x16x128xf32, #tpu.memory_space<vmem>>, vector<1x16x128xf32>
      %21 = vector.shape_cast %20 : vector<1x16x128xf32> to vector<16x128xf32>
      %22 = vector.shape_cast %19 : vector<16x128xf32> to vector<1x16x128xf32>
      tpu.vector_store %arg8[%c0_9, %c0_10, %c0_11], %22 {strides = array<i32>} : memref<1x16x128xf32, #tpu.memory_space<vmem>>, vector<1x16x128xf32>,
    } else {
    }
    return
  }
  func.func @transform_0(%arg0: i32, %arg1: i32) -> (i32, i32, i32) {
    %c1_i32 = arith.constant 1 : i32
    %0 = arith.subi %c1_i32, %arg0 : i32
    %1 = arith.muli %0, %arg1 : i32
    %c0_i32 = arith.constant 0 : i32
    %c0_i32_0 = arith.constant 0 : i32
    %c0_i32_1 = arith.constant 0 : i32
    return %1, %c0_i32, %c0_i32_0 : i32, i32, i32
  }
  func.func @transform_1(%arg0: i32, %arg1: i32) -> (i32, i32, i32) {
    %c0_i32 = arith.constant 0 : i32
    %c0_i32_0 = arith.constant 0 : i32
    %c0_i32_1 = arith.constant 0 : i32
    %c0_i32_2 = arith.constant 0 : i32
    return %c0_i32, %c0_i32_0, %c0_i32_1 : i32, i32, i32
  }
  func.func @transform_2(%arg0: i32, %arg1: i32) -> (i32, i32) {
    %c0_i32 = arith.constant 0 : i32
    %c0_i32_0 = arith.constant 0 : i32
    %c0_i32_1 = arith.constant 0 : i32
    return %c0_i32, %c0_i32_0 : i32, i32
  }
  func.func @transform_3(%arg0: i32, %arg1: i32) -> (i32, i32) {
    %c0_i32 = arith.constant 0 : i32
    %c0_i32_0 = arith.constant 0 : i32
    %c0_i32_1 = arith.constant 0 : i32
    return %c0_i32, %c0_i32_0 : i32, i32
  }
  func.func @transform_4(%arg0: i32, %arg1: i32) -> (i32, i32) {
    %c0_i32 = arith.constant 0 : i32
    %c0_i32_0 = arith.constant 0 : i32
    %c0_i32_1 = arith.constant 0 : i32
    return %c0_i32, %c0_i32_0 : i32, i32
  }
  func.func @transform_5(%arg0: i32, %arg1: i32) -> (i32, i32) {
    %c0_i32 = arith.constant 0 : i32
    %c0_i32_0 = arith.constant 0 : i32
    %c0_i32_1 = arith.constant 0 : i32
    return %c0_i32, %c0_i32_0 : i32, i32
  }
  func.func @transform_6(%arg0: i32, %arg1: i32) -> (i32, i32, i32) {
    %0 = arith.muli %arg0, %arg1 : i32
    %c0_i32 = arith.constant 0 : i32
    %c0_i32_0 = arith.constant 0 : i32
    %c0_i32_1 = arith.constant 0 : i32
    return %0, %c0_i32, %c0_i32_0 : i32, i32, i32
  }
}

</mosaic_0001>

<bundles_post_ra>
// kernel: conv_block.1
= control target key start
LH: loop header
LB: loop body
LE: loop exit
PB: predicated region body
PF: predicated region fallthrough
CT: control target
= control target key end

     0   :  { %s1514_s21 = smov 0   ;;  %s1516_s22 = smov 0   ;;  %s1807_s0 = inlined_call_operand.vmem [shape: f32[2,16,64], index: 0, kind: input, shape index: {}]   ;;  %s1808_s1 = inlined_call_operand.vmem [shape: f32[3,64,128], index: 1, kind: input, shape index: {}]   ;;  %s1809_s2 = inlined_call_operand.vmem [shape: f32[128,8], index: 2, kind: input, shape index: {}]   ;;  %s1810_s3 = inlined_call_operand.vmem [shape: f32[8,128], index: 3, kind: input, shape index: {}]   ;;  %s1811_s4 = inlined_call_operand.vmem [shape: f32[1,8], index: 4, kind: input, shape index: {}]   ;;  %s1812_s5 = inlined_call_operand.vmem [shape: f32[1,8], index: 5, kind: input, shape index: {}]   ;;  %s1813_s6 = inlined_call_operand.vmem [shape: f32[2,16,128], index: 6, kind: output, shape index: {}]  }
   0x1   :  { %s1518_s23 = smov 0   ;;  %s1520_s24 = smov 0  }
   0x2   :  { %s1522_s25 = smov 0  }
   0x3 LB: > { %s25_s26 = sadd.s32 1, %s1466_s23  ;;  %s28_s27 = sadd.s32 1, %s1470_s24  ;;  %s1474_s25 = sphi %s1522_s25, %s16_s25   ;;  %s1470_s24 = sphi %s1520_s24, %s1817_s24   ;;  %s1466_s23 = sphi %s1518_s23, %s1816_s23   ;;  %s1462_s22 = sphi %s1516_s22, %s1815_s22   ;;  %s1458_s21 = sphi %s1514_s21, %s1814_s21  }
   0x4   : > { %p26_p0 = scmp.ge.s32.totalorder %s25_s26, 2  ;;  %p1137_p1 = scmp.ge.s32.totalorder %s1474_s25, 1 }
   0x5   : > { %p234_p2 = scmp.lt.s32.totalorder %s1474_s25, 5 }
   0x6   : > { %s1819_s26 = smov (%p26_p0, %s25_s26), 0  ;;  %s1821_s27 = smov (!%p26_p0, %s28_s27), %s1470_s24 }
   0x7   : > { %p235_p3 = pnand %p1137_p1, %p234_p2  ;;  %p30_p4 = scmp.ge.s32.totalorder %s1821_s27, 2 }
   0x8   : > { %s267_s28 = ssub.s32 (!%p235_p3), 1, %s1462_s22  ;;  %s276_s29 = smul.u32 (!%p235_p3), %s1458_s21, %s1462_s22 }
   0x9   : > { %s1823_s27 = smov (%p30_p4, %s1821_s27), 0  ;;  %238 = sbr.rel (%p235_p3) target bundleno = 1156 (0x484), region = 44 }
   0xa   : > { %s268_s30 = smul.u32 (!%p235_p3), %s1458_s21, %s267_s28  ;;  %p277_p5 = scmp.lt.s32.totalorder (!%p235_p3), %s276_s29, 1 }
   0xb   : > { %p1142_p7 = scmp.ne.s32.totalorder (!%p235_p3), %s1462_s22, 0 }
   0xc   : > { %p269_p6 = scmp.lt.s32.totalorder (!%p235_p3), %s268_s30, 1 }
   0xe   : > { %s1825_s29 = smov (!%p277_p5, %s276_s29), 1  ;;  %s1827_s30 = smov (!%p269_p6, %s268_s30), 1 }
   0xf   : > { %s1178_s7 = sshll.u32 %s1825_s29, 4  ;;  %s1177_s8 = sshll.u32 %s1827_s30, 4 }
  0x10   : > { %s1555_s11 = scalar_lea.vmem %s1813_s6, %s1178_s7  ;;  %s273_s14 = scalar_lea.vmem %s1807_s0, %s1177_s8 }
  0x11   : > { %286 = sbr.rel (%p1142_p7) target bundleno = 278 (0x116), region = 48  ;;  %p1143_p8 = scmp.ne.s32.totalorder (!%p1142_p7), %s1458_s21, 0 }
  0x16   : > { %290 = sbr.rel (%p1143_p8) target bundleno = 29 (0x1d), region = 52 }
  0x1b   : > { %v1476_v0 = vmov 0.0  }
  0x1c   : > { %291 = vst [vmem:[#allocation3] sm:$0x1] %v1476_v0 }
  0x1d PF: > { %v1151_v1 = vld [vmem:[%s1808_s1 + $0x78] sm:$0xff]  ;;  %v1150_v3 = vld [vmem:[%s1808_s1 + $0x70] sm:$0xff]  ;;  %v294_v4 = vlaneseq  ;;  %v1149_v6 = vld [vmem:[%s1808_s1 + $0x68] sm:$0xff]  ;;  %vm332_vm2 = vcmask 523264   ;;  %s1166_s16 = sshll.u32 %s1458_s21, 4 }
  0x1e   : > { %v322_v2 = vld [vmem:[%s1808_s1 + $0x38] sm:$0xff]  ;;  %1249 = vmatprep.subr.mxu0 %v1151_v1  ;;  %v321_v5 = vld [vmem:[%s1808_s1 + $0x30] sm:$0xff]  ;;  %v320_v7 = vld [vmem:[%s1808_s1 + $0x28] sm:$0xff]  ;;  %s588_s17 = scalar_lea.vmem [#allocation2], %s1166_s16 }
  0x1f   : > { %1268 = vmatprep.subr.mxu1 %v322_v2  ;;  %1250 = vmatpush3.msra.mxu0 %v1151_v1  ;;  %v1148_v8 = vld [vmem:[%s1808_s1 + $0x60] sm:$0xff]  ;;  %v1586_v10 = vshrl.u32 %v294_v4, 7  ;;  %v1590_v12 = vld [vmem:[%s273_s14 + $0x8] sm:$0xff]  ;;  %v1147_v13 = vld [vmem:[%s1808_s1 + $0x58] sm:$0xff] }
  0x20   : > { %1269 = vmatpush3.msra.mxu1 %v322_v2  ;;  %1251 = vmatprep.subr.mxu0 %v1150_v3  ;;  %v319_v9 = vld [vmem:[%s1808_s1 + $0x20] sm:$0xff]  ;;  %v318_v14 = vld [vmem:[%s1808_s1 + $0x18] sm:$0xff]  ;;  %v300_v16 = vrot.slane %v1590_v12, 7  ;;  %v1146_v17 = vld [vmem:[%s1808_s1 + $0x50] sm:$0xff]  ;;  %v309_v25 = vrot.slane %v1590_v12, 1 }
  0x21   : > { %1270 = vmatprep.subr.mxu1 %v321_v5  ;;  %1252 = vmatpush3.msra.mxu0 %v1150_v3  ;;  %v1588_v11 = vld [vmem:[%s273_s14] sm:$0xff]  ;;  %v317_v18 = vld [vmem:[%s1808_s1 + $0x10] sm:$0xff]  ;;  %vm301_vm0 = vcmp.lt.s32.totalorder %v1586_v10, 1  ;;  %v1145_v19 = vld [vmem:[%s1808_s1 + $0x48] sm:$0xff]  ;;  %vm297_vm1 = vcmp.eq.s32.totalorder %v1586_v10, 0  ;;  %vm310_vm3 = vcmp.lt.s32.totalorder %v1586_v10, 7 }
  0x22   : > { %1271 = vmatpush3.msra.mxu1 %v321_v5  ;;  %1253 = vmatprep.subr.mxu0 %v1149_v6  ;;  %v299_v15 = vrot.slane %v1588_v11, 7  ;;  %v316_v20 = vld [vmem:[%s1808_s1 + $0x8] sm:$0xff]  ;;  %v1144_v22 = vld [vmem:[%s1808_s1 + $0x40] sm:$0xff]  ;;  %v308_v24 = vrot.slane %v1588_v11, 1  ;;  %v1163_v28 = vld [vmem:[%s1808_s1 + $0xb8] sm:$0xff]  ;;  %v296_v34 = vadd.s32 8, %v1586_v10 }
  0x23   : > { %1272 = vmatprep.subr.mxu1 %v320_v7  ;;  %1254 = vmatpush3.msra.mxu0 %v1149_v6  ;;  %v315_v23 = vld [vmem:[%s1808_s1] sm:$0xff]  ;;  %v1162_v30 = vld [vmem:[%s1808_s1 + $0xb0] sm:$0xff]  ;;  %v1161_v31 = vld [vmem:[%s1808_s1 + $0xa8] sm:$0xff] }
  0x24   : > { %1273 = vmatpush3.msra.mxu1 %v320_v7  ;;  %1255 = vmatprep.subr.mxu0 %v1148_v8  ;;  %v303_v21 = vsel %vm301_vm0, %v300_v16, %v299_v15  ;;  %v302_v27 = vsel %vm301_vm0, %v299_v15, %v300_v16  ;;  %v311_v29 = vsel %vm310_vm3, %v308_v24, %v309_v25  ;;  %v1160_v32 = vld [vmem:[%s1808_s1 + $0xa0] sm:$0xff]  ;;  %v1159_v33 = vld [vmem:[%s1808_s1 + $0x98] sm:$0xff]  ;;  %v1158_v35 = vld [vmem:[%s1808_s1 + $0x90] sm:$0xff]  ;;  %vm307_vm4 = vcmp.eq.s32.totalorder %v296_v34, 15 }
  0x25   : > { %1274 = vmatprep.subr.mxu1 %v319_v9  ;;  %1256 = vmatpush3.msra.mxu0 %v1148_v8  ;;  %v304_v26 = vsel %vm297_vm1, 0.0, %v303_v21  ;;  %v1157_v36 = vld [vmem:[%s1808_s1 + $0x88] sm:$0xff]  ;;  %v312_v37 = vsel %vm310_vm3, %v309_v25, %v308_v24  ;;  %v1156_v38 = vld [vmem:[%s1808_s1 + $0x80] sm:$0xff] }
  0x26   : > { %1275 = vmatpush3.msra.mxu1 %v319_v9  ;;  %1257 = vmatprep.subr.mxu0 %v1147_v13  ;;  %v314_v39 = vsel %vm307_vm4, 0.0, %v312_v37  ;;  %v591_v56 = vld [vmem:[#allocation3] sm:$0x1] }
  0x27   : > { %1276 = vmatprep.subr.mxu1 %v318_v14  ;;  %1258 = vmatpush3.msra.mxu0 %v1147_v13 }
  0x28   : > { %1277 = vmatpush3.msra.mxu1 %v318_v14  ;;  %1259 = vmatprep.subr.mxu0 %v1146_v17 }
  0x29   : > { %1278 = vmatprep.subr.mxu1 %v317_v18  ;;  %1260 = vmatpush3.msra.mxu0 %v1146_v17 }
  0x2a   : > { %1279 = vmatpush3.msra.mxu1 %v317_v18  ;;  %1261 = vmatprep.subr.mxu0 %v1145_v19 }
  0x2b   : > { %1280 = vmatprep.subr.mxu1 %v316_v20  ;;  %1262 = vmatpush3.msra.mxu0 %v1145_v19 }
  0x2c   : > { %1281 = vmatpush3.msra.mxu1 %v316_v20  ;;  %1263 = vmatprep.subr.mxu0 %v1144_v22 }
  0x2d   : > { %1282 = vmatprep.subr.mxu1 %v315_v23  ;;  %1264 = vmatpush3.msra.mxu0 %v1144_v22 }
  0x2e   : > { %1265 = vmatprep.mubr.msk.f32.mxu0 %vm332_vm2, %v1588_v11  ;;  %1283 = vmatpush3.msra.mxu1 %v315_v23 }
  0x2f   : > { %1284 = vmatprep.mubr.msk.f32.mxu1 %vm332_vm2, %v304_v26  ;;  %1266 = vmatmul.mubr.msk.f32.vlgmr.msra.gmra.mxu0 %vm332_vm2, %v1590_v12 }
  0x30   : > { %1285 = vmatmul.mubr.msk.f32.vlgmr.msra.gmra.mxu1 %vm332_vm2, %v302_v27  ;;  %1287 = vmatprep.subr.mxu0 %v1163_v28 }
  0x31   : > { %1303 = vmatprep.mubr.msk.f32.mxu0 %vm332_vm2, %v311_v29  ;;  %1288 = vmatpush3.msra.mxu0 %v1163_v28 }
  0x32   : > { %1289 = vmatprep.subr.mxu0 %v1162_v30 }
  0x33   : > { %1290 = vmatpush3.msra.mxu0 %v1162_v30 }
  0x34   : > { %1291 = vmatprep.subr.mxu0 %v1161_v31 }
  0x35   : > { %1292 = vmatpush3.msra.mxu0 %v1161_v31 }
  0x36   : > { %1293 = vmatprep.subr.mxu0 %v1160_v32 }
  0x37   : > { %1294 = vmatpush3.msra.mxu0 %v1160_v32 }
  0x38   : > { %1295 = vmatprep.subr.mxu0 %v1159_v33 }
  0x39   : > { %1296 = vmatpush3.msra.mxu0 %v1159_v33 }
  0x3a   : > { %1297 = vmatprep.subr.mxu0 %v1158_v35 }
  0x3b   : > { %1298 = vmatpush3.msra.mxu0 %v1158_v35 }
  0x3c   : > { %1299 = vmatprep.subr.mxu0 %v1157_v36 }
  0x3d   : > { %1300 = vmatpush3.msra.mxu0 %v1157_v36 }
  0x3e   : > { %1301 = vmatprep.subr.mxu0 %v1156_v38 }
  0x3f   : > { %1302 = vmatpush3.msra.mxu0 %v1156_v38 }
  0x40   : > { %1304 = vmatmul.mubr.msk.f32.vlgmr.msra.gmra.mxu0 %vm332_vm2, %v314_v39 }
  0xef   : > { %v1267_v40 = vpop.f32.mrf.mxu0 }
  0xf0   : > { %v1286_v41 = vpop.f32.mrf.mxu1 }
  0xf1   : > { %v405_v42 = vpop.f32.mrf.mxu0  ;;  %v492_v44 = vadd.f32 %v1286_v41, %v1267_v40 }
  0xf2   : > { %v486_v43 = vpop.f32.mrf.mxu1 }
  0xf3   : > { %v487_v46 = vadd.f32 %v486_v43, %v405_v42 }
 0x100   : > { %v1305_v45 = vpop.f32.mrf.mxu0 }
 0x101   : > { %v586_v47 = vadd.f32 %v1305_v45, %v492_v44 }
 0x102   : > { %v576_v48 = vpop.f32.mrf.mxu0 }
 0x103   : > { %590 = vst [vmem:[%s588_s17 + $0x8] sm:$0xff] %v586_v47  ;;  %v585_v49 = vadd.f32 %v576_v48, %v487_v46 }
 0x105   : > { %589 = vst [vmem:[%s588_s17] sm:$0xff] %v585_v49  ;;  %v592_v50 = vadd.f32 %v586_v47, %v585_v49 }
 0x107   : > { %v593_v51 = vrot.slane %v592_v50, 4 }
 0x109   : > { %v594_v52 = vadd.f32 %v593_v51, %v592_v50 }
 0x10b   : > { %v595_v53 = vrot.slane %v594_v52, 2 }
 0x10d   : > { %v596_v54 = vadd.f32 %v595_v53, %v594_v52 }
 0x10f   : > { %v597_v55 = vrot.slane %v596_v54, 1 }
 0x111   : > { %v598_v57 = vadd.f32 %v597_v55, %v596_v54 }
 0x113   : > { %v599_v58 = vadd.f32 %v598_v57, %v591_v56 }
 0x115   : > { %600 = vst [vmem:[#allocation3] sm:$0x1] %v599_v58 }
 0x116 PF: > { %p1167_p9 = scmp.ne.s32.totalorder %s1462_s22, 1 }
 0x117   : > { %p1168_p10 = scmp.ne.s32.totalorder (!%p1167_p9), %s1458_s21, 0 }
 0x118   : > { %604 = sbr.rel (%p1167_p9) target bundleno = 1156 (0x484), region = 56 }
 0x11d   : > { %608 = sbr.rel (%p1168_p10) target bundleno = 1145 (0x479), region = 60 }
 0x122   : > { %v1670_v59 = vld [vmem:[%s1809_s2 + $0x78] sm:$0xff]  ;;  %v1477_v60 = vmov 0.0   ;;  %v1676_v61 = vld [vmem:[%s1809_s2 + $0x70] sm:$0xff]  ;;  %vm1478_vm5 = vmmov 0   ;;  %v623_v62 = vld [vmem:[%s1809_s2 + $0x68] sm:$0xff]  ;;  %vm699_vm6 = vcmask 64512   ;;  %v775_v17 = vlaneseq }
 0x123   : > { %1306 = vmatprep.subr.mxu0 %v1477_v60  ;;  %1338 = vmatprep.mubr.msk.f32.mxu0 %vm1478_vm5, %v1477_v60  ;;  %v622_v63 = vld [vmem:[%s1809_s2 + $0x60] sm:$0xff]  ;;  %v621_v0 = vld [vmem:[%s1809_s2 + $0x58] sm:$0xff]  ;;  %v620_v1 = vld [vmem:[%s1809_s2 + $0x50] sm:$0xff] }
 0x124   : > { %1307 = vmatpush3.msra.mxu0 %v1670_v59  ;;  %1341 = vmatprep.subr.mxu1 %v1477_v60  ;;  %v619_v2 = vld [vmem:[%s1809_s2 + $0x48] sm:$0xff]  ;;  %v618_v3 = vld [vmem:[%s1809_s2 + $0x40] sm:$0xff]  ;;  %v617_v4 = vld [vmem:[%s1809_s2 + $0x38] sm:$0xff]  ;;  %v776_v18 = vshrl.u32 %v775_v17, 7 }
 0x125   : > { %1308 = vmatprep.subr.mxu0 %v1477_v60  ;;  %1343 = vmatprep.mubr.msk.f32.mxu1 %vm1478_vm5, %v1477_v60  ;;  %v616_v5 = vld [vmem:[%s1809_s2 + $0x30] sm:$0xff]  ;;  %v615_v6 = vld [vmem:[%s1809_s2 + $0x28] sm:$0xff]  ;;  %v614_v7 = vld [vmem:[%s1809_s2 + $0x20] sm:$0xff] }
 0x126   : > { %1309 = vmatpush3.msra.mxu0 %v1676_v61  ;;  %v613_v8 = vld [vmem:[%s1809_s2 + $0x18] sm:$0xff]  ;;  %v612_v9 = vld [vmem:[%s1809_s2 + $0x10] sm:$0xff]  ;;  %v611_v10 = vld [vmem:[%s1809_s2 + $0x8] sm:$0xff]  ;;  %v777_v19 = vsub.s32 0, %v776_v18 }
 0x127   : > { %1310 = vmatprep.subr.mxu0 %v1477_v60  ;;  %v610_v11 = vld [vmem:[%s1809_s2] sm:$0xff]  ;;  %v774_v22 = vld [vmem:[#allocation2 + $0x8] sm:$0xff]  ;;  %v792_v23 = vld [vmem:[#allocation2 + $0x10] sm:$0xff] }
 0x128   : > { %1311 = vmatpush3.msra.mxu0 %v623_v62  ;;  %v609_v12 = vld [vmem:[#allocation3] sm:$0x1]  ;;  %v793_v24 = vld [vmem:[#allocation2 + $0x18] sm:$0xff] }
 0x129   : > { %1312 = vmatprep.subr.mxu0 %v1477_v60  ;;  %v1748_v13 = vld [vmem:[%s1810_s3] sm:$0xff] }
 0x12a   : > { %1313 = vmatpush3.msra.mxu0 %v622_v63  ;;  %1342 = vmatpush3.msra.mxu1 %v1748_v13  ;;  %v773_v20 = vld [vmem:[#allocation2] sm:$0xff] }
 0x12b   : > { %1314 = vmatprep.subr.mxu0 %v1477_v60  ;;  %1346 = vmatprep.subr.mxu1 %v1477_v60  ;;  %v877_v54 = vld [vmem:[%s1811_s4] sm:$0x1] }
 0x12c   : > { %1315 = vmatpush3.msra.mxu0 %v621_v0  ;;  %v881_v57 = vld [vmem:[%s1812_s5] sm:$0x1] }
 0x12d   : > { %1316 = vmatprep.subr.mxu0 %v1477_v60 }
 0x12e   : > { %1317 = vmatpush3.msra.mxu0 %v620_v1 }
 0x12f   : > { %1318 = vmatprep.subr.mxu0 %v1477_v60 }
 0x130   : > { %1319 = vmatpush3.msra.mxu0 %v619_v2 }
 0x131   : > { %1320 = vmatprep.subr.mxu0 %v1477_v60 }
 0x132   : > { %1321 = vmatpush3.msra.mxu0 %v618_v3 }
 0x133   : > { %1322 = vmatprep.subr.mxu0 %v1477_v60 }
 0x134   : > { %1323 = vmatpush3.msra.mxu0 %v617_v4 }
 0x135   : > { %1324 = vmatprep.subr.mxu0 %v1477_v60 }
 0x136   : > { %1325 = vmatpush3.msra.mxu0 %v616_v5 }
 0x137   : > { %1326 = vmatprep.subr.mxu0 %v1477_v60 }
 0x138   : > { %1327 = vmatpush3.msra.mxu0 %v615_v6 }
 0x139   : > { %1328 = vmatprep.subr.mxu0 %v1477_v60 }
 0x13a   : > { %1329 = vmatpush3.msra.mxu0 %v614_v7 }
 0x13b   : > { %1330 = vmatprep.subr.mxu0 %v1477_v60 }
 0x13c   : > { %1331 = vmatpush3.msra.mxu0 %v613_v8 }
 0x13d   : > { %1332 = vmatprep.subr.mxu0 %v1477_v60 }
 0x13e   : > { %1333 = vmatpush3.msra.mxu0 %v612_v9 }
 0x13f   : > { %1334 = vmatprep.subr.mxu0 %v1477_v60 }
 0x140   : > { %1335 = vmatpush3.msra.mxu0 %v611_v10 }
 0x141   : > { %1336 = vmatprep.subr.mxu0 %v1477_v60 }
 0x142   : > { %1337 = vmatpush3.msra.mxu0 %v610_v11 }
 0x143   : > { %1339 = vmatmul.mubr.f32.vlgmr.msra.gmra.mxu0 %v609_v12  ;;  %1381 = vmatprep.subr.mxu0 %v1477_v60 }
 0x144   : > { %1383 = vmatprep.mubr.msk.f32.mxu0 %vm1478_vm5, %v1477_v60  ;;  %1382 = vmatpush3.msra.mxu0 %v1748_v13 }
 0x203   : > { %v692_v14 = vpop.f32.mrf.mxu0 }
 0x204   : > { %v1753_v15 = vmul.f32 0.001953125, %v692_v14 }
 0x205   : > { %v1340_v16 = vpop.f32.mrf.mxu0 }
 0x206   : > { %1344 = vmatmul.mubr.msk.f32.vlgmr.msra.gmra.mxu1 %vm699_vm6, %v1753_v15 }
 0x207   : > { %1347 = vmatpush3.msra.mxu1 %v1670_v59  ;;  %1378 = vmatprep.mubr.msk.f32.mxu1 %vm1478_vm5, %v1477_v60 }
 0x208   : > { %1348 = vmatprep.subr.mxu1 %v1477_v60 }
 0x209   : > { %1349 = vmatpush3.msra.mxu1 %v1676_v61 }
 0x20a   : > { %1350 = vmatprep.subr.mxu1 %v1477_v60 }
 0x20b   : > { %1351 = vmatpush3.msra.mxu1 %v623_v62 }
 0x20c   : > { %1352 = vmatprep.subr.mxu1 %v1477_v60 }
 0x20d   : > { %1353 = vmatpush3.msra.mxu1 %v622_v63 }
 0x20e   : > { %1354 = vmatprep.subr.mxu1 %v1477_v60 }
 0x20f   : > { %1355 = vmatpush3.msra.mxu1 %v621_v0 }
 0x210   : > { %1356 = vmatprep.subr.mxu1 %v1477_v60 }
 0x211   : > { %1357 = vmatpush3.msra.mxu1 %v620_v1 }
 0x212   : > { %1358 = vmatprep.subr.mxu1 %v1477_v60 }
 0x213   : > { %1359 = vmatpush3.msra.mxu1 %v619_v2 }
 0x214   : > { %1360 = vmatprep.subr.mxu1 %v1477_v60 }
 0x215   : > { %1361 = vmatpush3.msra.mxu1 %v618_v3 }
 0x216   : > { %1362 = vmatprep.subr.mxu1 %v1477_v60 }
 0x217   : > { %1363 = vmatpush3.msra.mxu1 %v617_v4 }
 0x218   : > { %1364 = vmatprep.subr.mxu1 %v1477_v60 }
 0x219   : > { %1365 = vmatpush3.msra.mxu1 %v616_v5 }
 0x21a   : > { %1366 = vmatprep.subr.mxu1 %v1477_v60 }
 0x21b   : > { %1367 = vmatpush3.msra.mxu1 %v615_v6 }
 0x21c   : > { %1368 = vmatprep.subr.mxu1 %v1477_v60 }
 0x21d   : > { %1369 = vmatpush3.msra.mxu1 %v614_v7 }
 0x21e   : > { %1370 = vmatprep.subr.mxu1 %v1477_v60 }
 0x21f   : > { %1371 = vmatpush3.msra.mxu1 %v613_v8 }
 0x220   : > { %1372 = vmatprep.subr.mxu1 %v1477_v60 }
 0x221   : > { %1373 = vmatpush3.msra.mxu1 %v612_v9 }
 0x222   : > { %1374 = vmatprep.subr.mxu1 %v1477_v60 }
 0x223   : > { %1375 = vmatpush3.msra.mxu1 %v611_v10 }
 0x224   : > { %1376 = vmatprep.subr.mxu1 %v1477_v60 }
 0x225   : > { %1377 = vmatpush3.msra.mxu1 %v610_v11 }
 0x226   : > { %1386 = vmatprep.subr.mxu1 %v1477_v60 }
 0x2c6   : > { %v769_v21 = vpop.f32.mrf.mxu1 }
 0x2c7   : > { %v778_v25 = vrot.slane %v769_v21, %v777_v19 }
 0x2c8   : > { %v1345_v26 = vpop.f32.mrf.mxu1 }
 0x2c9   : > { %v779_v27 = vsub.f32 %v773_v20, %v778_v25  ;;  %v780_v28 = vsub.f32 %v774_v22, %v778_v25  ;;  %v794_v29 = vsub.f32 %v792_v23, %v778_v25  ;;  %v795_v30 = vsub.f32 %v793_v24, %v778_v25 }
 0x2cb   : > { %v781_v31 = vmul.f32 %v779_v27, %v779_v27  ;;  %v782_v32 = vmul.f32 %v780_v28, %v780_v28  ;;  %v796_v33 = vmul.f32 %v794_v29, %v794_v29  ;;  %v797_v34 = vmul.f32 %v795_v30, %v795_v30 }
 0x2cd   : > { %v783_v35 = vadd.f32 %v782_v32, %v781_v31  ;;  %v798_v36 = vadd.f32 %v797_v34, %v796_v33 }
 0x2cf   : > { %v784_v37 = vrot.slane %v783_v35, 4  ;;  %v799_v38 = vrot.slane %v798_v36, 4 }
 0x2d1   : > { %v785_v39 = vadd.f32 %v784_v37, %v783_v35  ;;  %v800_v40 = vadd.f32 %v799_v38, %v798_v36 }
 0x2d3   : > { %v786_v41 = vrot.slane %v785_v39, 2  ;;  %v801_v42 = vrot.slane %v800_v40, 2 }
 0x2d5   : > { %v787_v43 = vadd.f32 %v786_v41, %v785_v39  ;;  %v802_v44 = vadd.f32 %v801_v42, %v800_v40 }
 0x2d7   : > { %v788_v45 = vrot.slane %v787_v43, 1  ;;  %v803_v46 = vrot.slane %v802_v44, 1 }
 0x2d9   : > { %v789_v47 = vadd.f32 %v788_v45, %v787_v43  ;;  %v804_v48 = vadd.f32 %v803_v46, %v802_v44 }
 0x2db   : > { %v805_v49 = vadd.f32 %v804_v48, %v789_v47 }
 0x2dd   : > { %1379 = vmatmul.mubr.f32.vlgmr.msra.gmra.mxu1 %v805_v49 }
 0x2de   : > { %1387 = vmatpush3.msra.mxu1 %v1748_v13  ;;  %1388 = vmatprep.mubr.msk.f32.mxu1 %vm1478_vm5, %v1477_v60 }
 0x39d   : > { %v872_v50 = vpop.f32.mrf.mxu1 }
 0x39e   : > { %v876_v51 = vmul.f32 0.001953125, %v872_v50 }
 0x39f   : > { %v1380_v52 = vpop.f32.mrf.mxu1 }
 0x3a0   : > { %v878_v53 = vadd.f32 1e-05, %v876_v51 }
 0x3a2   : > { %1434 = vrsqrt.f32 %v878_v53 }
 0x3af   : > { %v1435_v55 = vpop.eup %1434 }
 0x3b0   : > { %v880_v56 = vmul.f32 %v1435_v55, %v877_v54 }
 0x3b2   : > { %1384 = vmatmul.mubr.msk.f32.vlgmr.msra.gmra.mxu0 %vm699_vm6, %v880_v56  ;;  %v882_v58 = vmul.f32 %v880_v56, %v1753_v15 }
 0x3b4   : > { %v883_v59 = vsub.f32 %v881_v57, %v882_v58 }
 0x3b6   : > { %1389 = vmatmul.mubr.msk.f32.vlgmr.msra.gmra.mxu1 %vm699_vm6, %v883_v59 }
 0x472   : > { %v953_v60 = vpop.f32.mrf.mxu0 }
 0x473   : > { %957 = vst [vmem:[#allocation4] sm:$0x1] %v953_v60 }
 0x474   : > { %v1385_v61 = vpop.f32.mrf.mxu0 }
 0x476   : > { %v1028_v62 = vpop.f32.mrf.mxu1 }
 0x477   : > { %1032 = vst [vmem:[#allocation5] sm:$0x1] %v1028_v62 }
 0x478   : > { %v1390_v63 = vpop.f32.mrf.mxu1 }
 0x479 PF: > { %s1172_s22 = sshll.u32 %s1458_s21, 4 }
 0x47a   : > { %v1173_v0 = vld [vmem:[#allocation4] ss:$0 sm:$0xff]  ;;  %s1034_s28 = scalar_lea.vmem [#allocation2], %s1172_s22 }
 0x47b   : > { %v1035_v1 = vld [vmem:[%s1034_s28] sm:$0xff]  ;;  %v1036_v3 = vld [vmem:[%s1034_s28 + $0x8] sm:$0xff] }
 0x47c   : > { %v1044_v4 = vmul.f32 %v1173_v0, %v1035_v1  ;;  %v1045_v5 = vmul.f32 %v1173_v0, %v1036_v3 }
 0x47e   : > { %v1174_v2 = vld [vmem:[#allocation5] ss:$0 sm:$0xff] }
 0x47f   : > { %v1053_v6 = vadd.f32 %v1174_v2, %v1044_v4  ;;  %v1054_v7 = vadd.f32 %v1174_v2, %v1045_v5 }
 0x481   : > { %v1055_v8 = vmax.f32 %v1053_v6, 0.0  ;;  %v1056_v9 = vmax.f32 %v1054_v7, 0.0 }
 0x483   : > { %1057 = vst [vmem:[%s1555_s11] sm:$0xff] %v1055_v8  ;;  %1058 = vst [vmem:[%s1555_s11 + $0x8] sm:$0xff] %v1056_v9 }
 0x484 PF: > { %s16_s25 = sadd.s32 1, %s1474_s25   ;;  %s1814_s21 = smov %s1466_s23 }
 0x485   : > { %p13_p11 = scmp.ge.s32.totalorder %s16_s25, 6   ;;  %s1815_s22 = smov %s1470_s24 }
 0x486   : > { %s1816_s23 = smov %s1819_s26  ;;  %s1817_s24 = smov %s1823_s27 }
 0x487   :  { %15 = sbr.rel (!%p13_p11) target bundleno = 3 (0x3), region = 95 }

</bundles_post_ra>
